<compile_context>
chip_gen: v6e
topology: v6e:2x2x1
jax: 0.10.0
libtpu: 0.0.40
codegen_flags: <defaults>
</compile_context>

<pallas_src>
import jax
import jax.numpy as jnp
from jax.experimental import pallas as pl
from jax.experimental.pallas import tpu as pltpu

LANE = 128


def _round_up(x, m):
    return ((x + m - 1) // m) * m


def _dqn_kernel(x_ref, w1_ref, b1_ref, w2_ref, b2_ref, w3_ref, b3_ref, o_ref):
    # x_ref: (TB, D) f32; w*: bf16; b*: (1, H) f32; o_ref: (TB, A_pad) f32.
    x = x_ref[...].astype(jnp.bfloat16)  # cast in-kernel, hidden under the DMA
    h1 = jnp.dot(x, w1_ref[...], preferred_element_type=jnp.float32) + b1_ref[...]
    h1 = jnp.maximum(h1, 0.0).astype(jnp.bfloat16)
    h2 = jnp.dot(h1, w2_ref[...], preferred_element_type=jnp.float32) + b2_ref[...]
    h2 = jnp.maximum(h2, 0.0).astype(jnp.bfloat16)
    out = jnp.dot(h2, w3_ref[...], preferred_element_type=jnp.float32) + b3_ref[...]
    o_ref[...] = out.astype(o_ref.dtype)


def prepare_params(params):
    """One-time weight preparation (hoisted out of the per-call forward).

    Casts weights to bf16, reshapes biases to (1, H) f32, and zero-pads the
    final layer to a lane-dense 128-column output.  Call once; reuse the
    result for every dqn_forward call.
    """
    w1, b1, w2, b2, w3, b3 = params
    H1 = w1.shape[1]
    H2 = w2.shape[1]
    A = w3.shape[1]
    A_pad = _round_up(max(A, LANE), LANE)

    w1b = w1.astype(jnp.bfloat16)
    w2b = w2.astype(jnp.bfloat16)
    w3p = jnp.zeros((H2, A_pad), jnp.bfloat16).at[:, :A].set(w3.astype(jnp.bfloat16))
    b1r = b1.astype(jnp.float32).reshape(1, H1)
    b2r = b2.astype(jnp.float32).reshape(1, H2)
    b3p = jnp.zeros((1, A_pad), jnp.float32).at[0, :A].set(b3.astype(jnp.float32))
    return (w1b, b1r, w2b, b2r, w3p, b3p, A)


def dqn_forward(x_nchw, prepared, *, batch_tile=1024):
    """Forward pass of DQN.

    x_nchw: [B, C, H, W] float32.  `prepared` comes from prepare_params().
    Returns [B, num_actions] float32 Q-values.
    """
    w1b, b1r, w2b, b2r, w3p, b3p, num_actions = prepared
    B = x_nchw.shape[0]
    x_flat = x_nchw.reshape(B, -1)  # nn.Flatten() (row-major); stays f32
    D = x_flat.shape[1]
    H1 = w1b.shape[1]
    H2 = w2b.shape[1]
    A_pad = w3p.shape[1]

    # Batch tiling:
    #  * B <= 512: one full-array block (pad at most 7 rows to a sublane multiple).
    #  * larger B: 256-aligned tile up to `batch_tile`, >= 2 grid steps so the
    #    ("parallel",) batch axis shards across both v7x TensorCores; any partial
    #    last block is handled by Pallas masked stores (no wrapper-side pad).
    if B <= 512:
        B_run = _round_up(B, 8)
        if B_run != B:
            x_flat = jnp.pad(x_flat, ((0, B_run - B), (0, 0)))  # <= 7 rows, negligible
        TB = B_run
    else:
        B_run = B
        TB = min(_round_up(batch_tile, 256),
                 max(256, _round_up(pl.cdiv(B, 2), 256)))
    grid = (pl.cdiv(B_run, TB),)

    # Cost estimate (advisory, per call).
    w_elems = D * H1 + H1 * H2 + H2 * A_pad
    flops = 2 * B_run * w_elems
    bytes_accessed = (
        B_run * D * 4                # f32 activations in
        + w_elems * 2                # bf16 weights
        + (H1 + H2 + A_pad) * 4      # f32 biases
        + B_run * A_pad * 4          # f32 output
    )

    # Explicit scoped-VMEM limit (v5e default is only 16 MiB).
    act_bytes = 2 * (TB * D * 4 + TB * A_pad * 4)            # double-buffered in/out
    w_bytes = w_elems * 2 + (H1 + H2 + A_pad) * 4
    scratch_bytes = 6 * TB * max(H1, H2) * 4                  # rough: h1/h2 + bf16 temps
    vmem_needed = act_bytes + 2 * w_bytes + scratch_bytes
    vmem_limit = int(min(max(2 * vmem_needed, 32 << 20), 60 << 20))

    out = pl.pallas_call(
        _dqn_kernel,
        out_shape=jax.ShapeDtypeStruct((B_run, A_pad), jnp.float32),
        grid=grid,
        in_specs=[
            pl.BlockSpec((TB, D), lambda i: (i, 0)),      # activations: move per step
            pl.BlockSpec((D, H1), lambda i: (0, 0)),      # weights/biases: VMEM-resident
            pl.BlockSpec((1, H1), lambda i: (0, 0)),
            pl.BlockSpec((H1, H2), lambda i: (0, 0)),
            pl.BlockSpec((1, H2), lambda i: (0, 0)),
            pl.BlockSpec((H2, A_pad), lambda i: (0, 0)),
            pl.BlockSpec((1, A_pad), lambda i: (0, 0)),
        ],
        out_specs=pl.BlockSpec((TB, A_pad), lambda i: (i, 0)),
        compiler_params=pltpu.CompilerParams(
            dimension_semantics=("parallel",),
            vmem_limit_bytes=vmem_limit),
        cost_estimate=pl.CostEstimate(
            flops=flops, transcendentals=0, bytes_accessed=bytes_accessed),
    )(x_flat, w1b, b1r, w2b, b2r, w3p, b3p)

    # Slice away any batch rounding and the zero-padded action columns.
    return out[:B, :num_actions]


def init_dqn_params(key, num_inputs, num_actions, hidden=128):
    """Deterministic init mimicking PyTorch nn.Linear default (uniform +/- 1/sqrt(fan_in)).
    Weights stored as (in_features, out_features)."""
    ks = jax.random.split(key, 6)

    def lin(kw, kb, fan_in, fan_out):
        bound = 1.0 / jnp.sqrt(fan_in)
        w = jax.random.uniform(kw, (fan_in, fan_out), jnp.float32, -bound, bound)
        b = jax.random.uniform(kb, (fan_out,), jnp.float32, -bound, bound)
        return w, b

    w1, b1 = lin(ks[0], ks[1], num_inputs, hidden)
    w2, b2 = lin(ks[2], ks[3], hidden, hidden)
    w3, b3 = lin(ks[4], ks[5], hidden, num_actions)
    return (w1, b1, w2, b2, w3, b3)


def dqn_reference_bf16(x_nchw, params):
    """Pure-JAX reference with the same bf16-input / f32-accumulate numerics as the kernel."""
    w1, b1, w2, b2, w3, b3 = params
    x = x_nchw.reshape(x_nchw.shape[0], -1).astype(jnp.bfloat16)
    h1 = jnp.dot(x, w1.astype(jnp.bfloat16), preferred_element_type=jnp.float32) + b1
    h1 = jnp.maximum(h1, 0.0).astype(jnp.bfloat16)
    h2 = jnp.dot(h1, w2.astype(jnp.bfloat16), preferred_element_type=jnp.float32) + b2
    h2 = jnp.maximum(h2, 0.0).astype(jnp.bfloat16)
    return jnp.dot(h2, w3.astype(jnp.bfloat16), preferred_element_type=jnp.float32) + b3


if __name__ == "__main__":
    key = jax.random.PRNGKey(0)
    k_x, k_p = jax.random.split(key)

    # Small shapes: batch=2, channels=4, spatial=16 -> num_inputs = 4*16*16 = 1024
    B, C, H, W = 2, 4, 16, 16
    num_inputs = C * H * W
    num_actions = 4

    x = jax.random.normal(k_x, (B, C, H, W), dtype=jnp.float32)
    params = init_dqn_params(k_p, num_inputs, num_actions)

    # One-time weight prep (hoisted out of the per-step forward).
    prepared = jax.block_until_ready(prepare_params(params))

    out = dqn_forward(x, prepared)
    out = jax.block_until_ready(out)

    ref = dqn_reference_bf16(x, params)
    assert out.shape == (B, num_actions), out.shape
    assert jnp.allclose(out, ref, atol=2e-2, rtol=2e-2), (
        "mismatch vs reference: max abs diff = %f" % float(jnp.max(jnp.abs(out - ref))))

    print("KERNEL_OK")
</pallas_src>

<mosaic_0001>
module attributes {stable_mosaic.version = 11 : i64} {
  func.func @_dqn_kernel(%arg0: i32, %arg1: memref<8x1024xf32, #tpu.memory_space<vmem>>, %arg2: memref<1024x128xbf16, #tpu.memory_space<vmem>>, %arg3: memref<1x128xf32, #tpu.memory_space<vmem>>, %arg4: memref<128x128xbf16, #tpu.memory_space<vmem>>, %arg5: memref<1x128xf32, #tpu.memory_space<vmem>>, %arg6: memref<128x128xbf16, #tpu.memory_space<vmem>>, %arg7: memref<1x128xf32, #tpu.memory_space<vmem>>, %arg8: memref<8x128xf32, #tpu.memory_space<vmem>>) attributes {dimension_semantics = [#tpu.dimension_semantics<parallel>], iteration_bounds = array<i64: 1>, scalar_prefetch = 0 : i64, scratch_operands = 0 : i64, tpu.core_type = #tpu.core_type<tc>, window_params = [{transform_indices = @transform_0, window_bounds = array<i64: 8, 1024>}, {pipeline_mode = #tpu.pipeline_mode<synchronous>, transform_indices = @transform_1, window_bounds = array<i64: 1024, 128>}, {pipeline_mode = #tpu.pipeline_mode<synchronous>, transform_indices = @transform_2, window_bounds = array<i64: 1, 128>}, {pipeline_mode = #tpu.pipeline_mode<synchronous>, transform_indices = @transform_3, window_bounds = array<i64: 128, 128>}, {pipeline_mode = #tpu.pipeline_mode<synchronous>, transform_indices = @transform_4, window_bounds = array<i64: 1, 128>}, {pipeline_mode = #tpu.pipeline_mode<synchronous>, transform_indices = @transform_5, window_bounds = array<i64: 128, 128>}, {pipeline_mode = #tpu.pipeline_mode<synchronous>, transform_indices = @transform_6, window_bounds = array<i64: 1, 128>}, {transform_indices = @transform_7, window_bounds = array<i64: 8, 128>}]} {
    %c0 = arith.constant 0 : index
    %c0_0 = arith.constant 0 : index
    %0 = vector.load %arg1[%c0, %c0_0] : memref<8x1024xf32, #tpu.memory_space<vmem>>, vector<8x1024xf32>
    %1 = arith.truncf %0 : vector<8x1024xf32> to vector<8x1024xbf16>
    %c0_1 = arith.constant 0 : index
    %c0_2 = arith.constant 0 : index
    %2 = vector.load %arg2[%c0_1, %c0_2] : memref<1024x128xbf16, #tpu.memory_space<vmem>>, vector<1024x128xbf16>
    %cst = arith.constant dense<0.000000e+00> : vector<8x128xf32>
    %3 = tpu.matmul %1, %2, %cst {dimension_numbers = #tpu.dot_dimension_numbers<[1], [0], [0], [1], [0, 0, 1, 1], [], []>} : vector<8x1024xbf16>, vector<1024x128xbf16>, vector<8x128xf32> -> vector<8x128xf32>
    %c0_3 = arith.constant 0 : index
    %c0_4 = arith.constant 0 : index
    %4 = vector.load %arg3[%c0_3, %c0_4] : memref<1x128xf32, #tpu.memory_space<vmem>>, vector<1x128xf32>
    %5 = vector.broadcast %4 : vector<1x128xf32> to vector<8x128xf32>
    %6 = arith.addf %3, %5 : vector<8x128xf32>
    %cst_5 = arith.constant 0.000000e+00 : f32
    %7 = vector.broadcast %cst_5 : f32 to vector<8x128xf32>
    %8 = arith.maximumf %6, %7 : vector<8x128xf32>
    %9 = arith.truncf %8 : vector<8x128xf32> to vector<8x128xbf16>
    %c0_6 = arith.constant 0 : index
    %c0_7 = arith.constant 0 : index
    %10 = vector.load %arg4[%c0_6, %c0_7] : memref<128x128xbf16, #tpu.memory_space<vmem>>, vector<128x128xbf16>
    %cst_8 = arith.constant dense<0.000000e+00> : vector<8x128xf32>
    %11 = tpu.matmul %9, %10, %cst_8 {dimension_numbers = #tpu.dot_dimension_numbers<[1], [0], [0], [1], [0, 0, 1, 1], [], []>} : vector<8x128xbf16>, vector<128x128xbf16>, vector<8x128xf32> -> vector<8x128xf32>
    %c0_9 = arith.constant 0 : index
    %c0_10 = arith.constant 0 : index
    %12 = vector.load %arg5[%c0_9, %c0_10] : memref<1x128xf32, #tpu.memory_space<vmem>>, vector<1x128xf32>
    %13 = vector.broadcast %12 : vector<1x128xf32> to vector<8x128xf32>
    %14 = arith.addf %11, %13 : vector<8x128xf32>
    %cst_11 = arith.constant 0.000000e+00 : f32
    %15 = vector.broadcast %cst_11 : f32 to vector<8x128xf32>
    %16 = arith.maximumf %14, %15 : vector<8x128xf32>
    %17 = arith.truncf %16 : vector<8x128xf32> to vector<8x128xbf16>
    %c0_12 = arith.constant 0 : index
    %c0_13 = arith.constant 0 : index
    %18 = vector.load %arg6[%c0_12, %c0_13] : memref<128x128xbf16, #tpu.memory_space<vmem>>, vector<128x128xbf16>
    %cst_14 = arith.constant dense<0.000000e+00> : vector<8x128xf32>
    %19 = tpu.matmul %17, %18, %cst_14 {dimension_numbers = #tpu.dot_dimension_numbers<[1], [0], [0], [1], [0, 0, 1, 1], [], []>} : vector<8x128xbf16>, vector<128x128xbf16>, vector<8x128xf32> -> vector<8x128xf32>
    %c0_15 = arith.constant 0 : index
    %c0_16 = arith.constant 0 : index
    %20 = vector.load %arg7[%c0_15, %c0_16] : memref<1x128xf32, #tpu.memory_space<vmem>>, vector<1x128xf32>
    %21 = vector.broadcast %20 : vector<1x128xf32> to vector<8x128xf32>
    %22 = arith.addf %19, %21 : vector<8x128xf32>
    %c0_17 = arith.constant 0 : index
    %c0_18 = arith.constant 0 : index
    %23 = vector.load %arg8[%c0_17, %c0_18] : memref<8x128xf32, #tpu.memory_space<vmem>>, vector<8x128xf32>
    tpu.vector_store %arg8[%c0_17, %c0_18], %22 {strides = array<i32>} : memref<8x128xf32, #tpu.memory_space<vmem>>, vector<8x128xf32>,
    return
  }
  func.func @transform_0(%arg0: i32) -> (i32, i32) {
    %c0_i32 = arith.constant 0 : i32
    %c0_i32_0 = arith.constant 0 : i32
    return %arg0, %c0_i32 : i32, i32
  }
  func.func @transform_1(%arg0: i32) -> (i32, i32) {
    %c0_i32 = arith.constant 0 : i32
    %c0_i32_0 = arith.constant 0 : i32
    %c0_i32_1 = arith.constant 0 : i32
    return %c0_i32, %c0_i32_0 : i32, i32
  }
  func.func @transform_2(%arg0: i32) -> (i32, i32) {
    %c0_i32 = arith.constant 0 : i32
    %c0_i32_0 = arith.constant 0 : i32
    %c0_i32_1 = arith.constant 0 : i32
    return %c0_i32, %c0_i32_0 : i32, i32
  }
  func.func @transform_3(%arg0: i32) -> (i32, i32) {
    %c0_i32 = arith.constant 0 : i32
    %c0_i32_0 = arith.constant 0 : i32
    %c0_i32_1 = arith.constant 0 : i32
    return %c0_i32, %c0_i32_0 : i32, i32
  }
  func.func @transform_4(%arg0: i32) -> (i32, i32) {
    %c0_i32 = arith.constant 0 : i32
    %c0_i32_0 = arith.constant 0 : i32
    %c0_i32_1 = arith.constant 0 : i32
    return %c0_i32, %c0_i32_0 : i32, i32
  }
  func.func @transform_5(%arg0: i32) -> (i32, i32) {
    %c0_i32 = arith.constant 0 : i32
    %c0_i32_0 = arith.constant 0 : i32
    %c0_i32_1 = arith.constant 0 : i32
    return %c0_i32, %c0_i32_0 : i32, i32
  }
  func.func @transform_6(%arg0: i32) -> (i32, i32) {
    %c0_i32 = arith.constant 0 : i32
    %c0_i32_0 = arith.constant 0 : i32
    %c0_i32_1 = arith.constant 0 : i32
    return %c0_i32, %c0_i32_0 : i32, i32
  }
  func.func @transform_7(%arg0: i32) -> (i32, i32) {
    %c0_i32 = arith.constant 0 : i32
    %c0_i32_0 = arith.constant 0 : i32
    return %arg0, %c0_i32 : i32, i32
  }
}

</mosaic_0001>

<bundles_post_ra>
// kernel: tpu_custom_call.1
= control target key start
LH: loop header
LB: loop body
LE: loop exit
PB: predicated region body
PF: predicated region fallthrough
CT: control target
= control target key end

     0   :  { %12 = vsyncpa [#allocation3], 0  ;;  %s1546_s0 = inlined_call_operand.hbm [shape: f32[8,1024], index: 0, kind: input, shape index: {}]   ;;  %s1547_s1 = inlined_call_operand.hbm [shape: bf16[1024,128], index: 1, kind: input, shape index: {}]   ;;  %s1548_s2 = inlined_call_operand.vmem [shape: f32[1,128], index: 2, kind: input, shape index: {}]   ;;  %s1549_s3 = inlined_call_operand.hbm [shape: bf16[128,128], index: 3, kind: input, shape index: {}]   ;;  %s1550_s4 = inlined_call_operand.vmem [shape: f32[1,128], index: 4, kind: input, shape index: {}]   ;;  %s1551_s5 = inlined_call_operand.hbm [shape: bf16[128,128], index: 5, kind: input, shape index: {}]   ;;  %s1552_s6 = inlined_call_operand.vmem [shape: f32[1,128], index: 6, kind: input, shape index: {}]   ;;  %s1553_s7 = inlined_call_operand.hbm [shape: f32[8,128], index: 7, kind: output, shape index: {}]  }
   0x1   :  { %13 = vsyncpa [#allocation6], 0 }
   0x2   :  { %14 = vsyncpa [#allocation9], 0 }
   0x3   :  { %15 = vsyncpa [#allocation4], 0  ;;  %s1446_s24 = smov [#allocation5]  }
   0x4   :  { %s31_s25 = sshll.u32 %s1446_s24, 4  ;;  %s32_s25 = int_to_ptr.vmem [resolvable:$true] %s31_s25 }
   0x5   :  { %s1346_s26 = scalar_lea.vmem %s32_s25, 8192  ;;  %p1351_p1 = scmp.lt.s32.totalorder %s32_s25, %s32_s25 }
   0x6   :  { %p1347_p0 = scmp.ne.s32.totalorder %s32_s25, %s1346_s26  ;;  %p1352_p2 = scmp.lt.s32.totalorder %s1346_s26, %s1346_s26 }
   0x8   :  { %p1353_p3 = por %p1352_p2, %p1351_p1 }
   0xa   :  { %p1354_p4 = pnand %p1353_p3, %p1347_p0 }
   0xc   :  { %1357 = shalt.err (!%p1354_p4)
}
   0xd   :  { %s1447_s27 = smov 64   ;;  %s1448_s28 = smov 4  }
   0xe   :  { %37 = dma.hbm_to_vmem [thread:$0]  %s1547_s1, 8192, %s32_s25, [#allocation6], %s1447_s27, %s1447_s27, %s1448_s28  }
   0xf   :  { %s1449_s8 = smov [#allocation2]   ;;  %s1450_s10 = smov [#allocation7]  }
  0x10   :  { %s22_s9 = sshll.u32 %s1449_s8, 4  ;;  %s45_s11 = sshll.u32 %s1450_s10, 4  ;;  %s23_s9 = int_to_ptr.vmem [resolvable:$true] %s22_s9  ;;  %s46_s11 = int_to_ptr.vmem [resolvable:$true] %s45_s11 }
  0x11   :  { %s1366_s12 = scalar_lea.vmem %s23_s9, 1024  ;;  %p1371_p6 = scmp.lt.s32.totalorder %s23_s9, %s23_s9 }
  0x12   :  { %p1367_p5 = scmp.ne.s32.totalorder %s23_s9, %s1366_s12  ;;  %p1372_p7 = scmp.lt.s32.totalorder %s1366_s12, %s1366_s12 }
  0x14   :  { %p1373_p8 = por %p1372_p7, %p1371_p6 }
  0x16   :  { %p1374_p9 = pnand %p1373_p8, %p1367_p5 }
  0x18   :  { %1377 = shalt.err (!%p1374_p9)
}
  0x19   :  { %25 = dma.hbm_to_vmem [thread:$0]  %s1546_s0, 1024, %s23_s9, [#allocation3]  }
  0x1a   :  { %s1386_s15 = scalar_lea.vmem %s46_s11, 1024  ;;  %p1391_p11 = scmp.lt.s32.totalorder %s46_s11, %s46_s11 }
  0x1b   :  { %p1387_p10 = scmp.ne.s32.totalorder %s46_s11, %s1386_s15  ;;  %p1392_p12 = scmp.lt.s32.totalorder %s1386_s15, %s1386_s15 }
  0x1d   :  { %p1393_p13 = por %p1392_p12, %p1391_p11 }
  0x1f   :  { %p1394_p0 = pnand %p1393_p13, %p1387_p10 }
  0x21   :  { %1397 = shalt.err (!%p1394_p0)
}
  0x22   :  { %51 = dma.hbm_to_vmem [thread:$0]  %s1549_s3, 1024, %s46_s11, [#allocation6], %s1447_s27, %s1447_s27, %s1448_s28  }
  0x23   :  { %s1451_s17 = smov [#allocation8]  }
  0x24   :  { %s59_s18 = sshll.u32 %s1451_s17, 4  ;;  %s60_s18 = int_to_ptr.vmem [resolvable:$true] %s59_s18 }
  0x25   :  { %s1406_s19 = scalar_lea.vmem %s60_s18, 1024  ;;  %p1411_p2 = scmp.lt.s32.totalorder %s60_s18, %s60_s18 }
  0x26   :  { %p1407_p1 = scmp.ne.s32.totalorder %s60_s18, %s1406_s19  ;;  %p1412_p3 = scmp.lt.s32.totalorder %s1406_s19, %s1406_s19 }
  0x28   :  { %p1413_p4 = por %p1412_p3, %p1411_p2 }
  0x2a   :  { %p1414_p5 = pnand %p1413_p4, %p1407_p1 }
  0x2c   :  { %1417 = shalt.err (!%p1414_p5)
}
  0x2d   :  { %65 = dma.hbm_to_vmem [thread:$0]  %s1551_s5, 1024, %s60_s18, [#allocation9], %s1447_s27, %s1447_s27, %s1448_s28  }
  0x2e   :  { %1438 = dma.done.wait [#allocation3], 1024  }
  0x2f   :  { %1439 = vsyncadd [#allocation3], 4294966272 }
  0x30   :  { %1440 = dma.done.wait [#allocation6], 9216  }
  0x31   :  { %1441 = vsyncadd [#allocation6], 4294958080 }
  0x32   :  { %1442 = dma.done.wait [#allocation9], 1024  }
  0x33   :  { %1443 = vsyncadd [#allocation9], 4294966272  ;;  %v1258_v0 = vld [vmem:[#allocation5 + $0x78] sm:$0xff]   ;;  %v1262_v4 = vld [vmem:[#allocation5 + $0x70] sm:$0xff]   ;;  %vm1453_vm0 = vmmov 0   ;;  %s1454_s24 = smov [#allocation10]  }
  0x34   :  { %v1259_v1 = vld [vmem:[#allocation5 + $0xf8] sm:$0xff]   ;;  %1103 = vmatprep.subr.bf16.mxu0 %v1258_v0  ;;  %v1263_v5 = vld [vmem:[#allocation5 + $0xf0] sm:$0xff]   ;;  %v1266_v8 = vld [vmem:[#allocation5 + $0x68] sm:$0xff]   ;;  %s1009_s25 = sshll.u32 %s1454_s24, 4  ;;  %s1010_s25 = int_to_ptr.vmem [resolvable:$true] %s1009_s25 }
  0x35   :  { %v1260_v2 = vld [vmem:[#allocation5 + $0x38] sm:$0xff]   ;;  %1125 = vmatprep.subr.bf16.mxu1 %v1259_v1  ;;  %v1264_v6 = vld [vmem:[#allocation5 + $0x30] sm:$0xff]   ;;  %v1267_v9 = vld [vmem:[#allocation5 + $0xe8] sm:$0xff]   ;;  %p1423_p7 = scmp.lt.s32.totalorder %s1010_s25, %s1010_s25 }
  0x36   :  { %v1261_v3 = vld [vmem:[#allocation5 + $0xb8] sm:$0xff]   ;;  %1104 = vmatpush3.bf16.msra.mxu0 %v1260_v2  ;;  %v1265_v7 = vld [vmem:[#allocation5 + $0xb0] sm:$0xff]   ;;  %v1268_v10 = vld [vmem:[#allocation5 + $0x28] sm:$0xff]  }
  0x37   :  { %1126 = vmatpush3.bf16.msra.mxu1 %v1261_v3  ;;  %1105 = vmatprep.subr.bf16.mxu0 %v1262_v4  ;;  %v1269_v11 = vld [vmem:[#allocation5 + $0xa8] sm:$0xff]   ;;  %v1270_v12 = vld [vmem:[#allocation5 + $0x60] sm:$0xff]   ;;  %v1274_v16 = vld [vmem:[#allocation5 + $0x58] sm:$0xff]  }
  0x38   :  { %1127 = vmatprep.subr.bf16.mxu1 %v1263_v5  ;;  %v1271_v13 = vld [vmem:[#allocation5 + $0xe0] sm:$0xff]   ;;  %v1275_v17 = vld [vmem:[#allocation5 + $0xd8] sm:$0xff]   ;;  %v1278_v20 = vld [vmem:[#allocation5 + $0x50] sm:$0xff]  }
  0x39   :  { %v1272_v14 = vld [vmem:[#allocation5 + $0x20] sm:$0xff]   ;;  %v1276_v18 = vld [vmem:[#allocation5 + $0x18] sm:$0xff]   ;;  %v1279_v21 = vld [vmem:[#allocation5 + $0xd0] sm:$0xff]  }
  0x3a   :  { %1106 = vmatpush3.bf16.msra.mxu0 %v1264_v6  ;;  %v1273_v15 = vld [vmem:[#allocation5 + $0xa0] sm:$0xff]   ;;  %v1277_v19 = vld [vmem:[#allocation5 + $0x98] sm:$0xff]   ;;  %v1280_v22 = vld [vmem:[#allocation5 + $0x10] sm:$0xff]  }
  0x3b   :  { %1128 = vmatpush3.bf16.msra.mxu1 %v1265_v7  ;;  %1107 = vmatprep.subr.bf16.mxu0 %v1266_v8  ;;  %v1281_v23 = vld [vmem:[#allocation5 + $0x90] sm:$0xff]   ;;  %v1282_v24 = vld [vmem:[#allocation5 + $0x48] sm:$0xff]   ;;  %v1286_v28 = vld [vmem:[#allocation5 + $0x40] sm:$0xff]  }
  0x3c   :  { %1129 = vmatprep.subr.bf16.mxu1 %v1267_v9  ;;  %v1283_v25 = vld [vmem:[#allocation5 + $0xc8] sm:$0xff]   ;;  %v1287_v29 = vld [vmem:[#allocation5 + $0xc0] sm:$0xff]   ;;  %v84_v33 = vld [vmem:[#allocation2 + $0x18] sm:$0xff] }
  0x3d   :  { %v1284_v26 = vld [vmem:[#allocation5 + $0x8] sm:$0xff]   ;;  %v1288_v30 = vld [vmem:[#allocation5] sm:$0xff]   ;;  %v92_v36 = vpack.c.bf16 %v84_v33, %v84_v33  ;;  %v83_v38 = vld [vmem:[#allocation2 + $0x10] sm:$0xff] }
  0x3e   :  { %1108 = vmatpush3.bf16.msra.mxu0 %v1268_v10  ;;  %v1285_v27 = vld [vmem:[#allocation5 + $0x88] sm:$0xff]   ;;  %v1289_v31 = vld [vmem:[#allocation5 + $0x80] sm:$0xff]   ;;  %v91_v39 = vpack.c.bf16 %v83_v38, %v83_v38  ;;  %v1290_v40 = vld [vmem:[#allocation5 + $0x178] sm:$0xff]  }
  0x3f   :  { %1130 = vmatpush3.bf16.msra.mxu1 %v1269_v11  ;;  %1109 = vmatprep.subr.bf16.mxu0 %v1270_v12  ;;  %v82_v32 = vld [vmem:[#allocation2 + $0x8] sm:$0xff]  ;;  %v81_v34 = vld [vmem:[#allocation2] sm:$0xff]  ;;  %v1291_v41 = vld [vmem:[#allocation5 + $0x1f8] sm:$0xff]  }
  0x40   :  { %1131 = vmatprep.subr.bf16.mxu1 %v1271_v13  ;;  %v90_v35 = vpack.c.bf16 %v82_v32, %v82_v32  ;;  %v89_v37 = vpack.c.bf16 %v81_v34, %v81_v34  ;;  %688 = vmatprep.mubr.bf16.mxu1 %v92_v36  ;;  %v1292_v42 = vld [vmem:[#allocation5 + $0x138] sm:$0xff]   ;;  %v1294_v44 = vld [vmem:[#allocation5 + $0x170] sm:$0xff]   ;;  %v1298_v48 = vld [vmem:[#allocation5 + $0x168] sm:$0xff]  }
  0x41   :  { %v1293_v43 = vld [vmem:[#allocation5 + $0x1b8] sm:$0xff]   ;;  %v1295_v45 = vld [vmem:[#allocation5 + $0x1f0] sm:$0xff]   ;;  %v1299_v49 = vld [vmem:[#allocation5 + $0x1e8] sm:$0xff]  }
  0x42   :  { %1110 = vmatpush3.bf16.msra.mxu0 %v1272_v14  ;;  %648 = vmatprep.mubr.bf16.mxu0 %v90_v35  ;;  %v1296_v46 = vld [vmem:[#allocation5 + $0x130] sm:$0xff]   ;;  %v1300_v50 = vld [vmem:[#allocation5 + $0x128] sm:$0xff]   ;;  %v1302_v52 = vld [vmem:[#allocation5 + $0x160] sm:$0xff]  }
  0x43   :  { %1132 = vmatpush3.bf16.msra.mxu1 %v1273_v15  ;;  %1111 = vmatprep.subr.bf16.mxu0 %v1274_v16  ;;  %v1297_v47 = vld [vmem:[#allocation5 + $0x1b0] sm:$0xff]   ;;  %v1301_v51 = vld [vmem:[#allocation5 + $0x1a8] sm:$0xff]   ;;  %v1303_v53 = vld [vmem:[#allocation5 + $0x1e0] sm:$0xff]  }
  0x44   :  { %1133 = vmatprep.subr.bf16.mxu1 %v1275_v17  ;;  %v1304_v54 = vld [vmem:[#allocation5 + $0x120] sm:$0xff]   ;;  %v1306_v56 = vld [vmem:[#allocation5 + $0x158] sm:$0xff]   ;;  %v1310_v60 = vld [vmem:[#allocation5 + $0x150] sm:$0xff]   ;;  %v1452_v17 = vmov 0.0  }
  0x45   :  { %v1305_v55 = vld [vmem:[#allocation5 + $0x1a0] sm:$0xff]   ;;  %v1307_v57 = vld [vmem:[#allocation5 + $0x1d8] sm:$0xff]   ;;  %v1311_v61 = vld [vmem:[#allocation5 + $0x1d0] sm:$0xff]  }
  0x46   :  { %1112 = vmatpush3.bf16.msra.mxu0 %v1276_v18  ;;  %v1308_v58 = vld [vmem:[#allocation5 + $0x118] sm:$0xff]   ;;  %v1312_v62 = vld [vmem:[#allocation5 + $0x110] sm:$0xff]   ;;  %v1314_v0 = vld [vmem:[#allocation5 + $0x148] sm:$0xff]  }
  0x47   :  { %1134 = vmatpush3.bf16.msra.mxu1 %v1277_v19  ;;  %1113 = vmatprep.subr.bf16.mxu0 %v1278_v20  ;;  %v1309_v59 = vld [vmem:[#allocation5 + $0x198] sm:$0xff]   ;;  %v1313_v63 = vld [vmem:[#allocation5 + $0x190] sm:$0xff]   ;;  %v1315_v1 = vld [vmem:[#allocation5 + $0x1c8] sm:$0xff]  }
  0x48   :  { %1135 = vmatprep.subr.bf16.mxu1 %v1279_v21  ;;  %v1316_v2 = vld [vmem:[#allocation5 + $0x108] sm:$0xff]   ;;  %v1318_v4 = vld [vmem:[#allocation5 + $0x140] sm:$0xff]   ;;  %v88_v9 = vld [vmem:[#allocation2 + $0x38] sm:$0xff] }
  0x49   :  { %v1317_v3 = vld [vmem:[#allocation5 + $0x188] sm:$0xff]   ;;  %v1319_v5 = vld [vmem:[#allocation5 + $0x1c0] sm:$0xff]   ;;  %v96_v11 = vpack.c.bf16 %v88_v9, %v88_v9  ;;  %v87_v13 = vld [vmem:[#allocation2 + $0x30] sm:$0xff] }
  0x4a   :  { %1114 = vmatpush3.bf16.msra.mxu0 %v1280_v22  ;;  %v1320_v6 = vld [vmem:[#allocation5 + $0x100] sm:$0xff]   ;;  %v86_v8 = vld [vmem:[#allocation2 + $0x28] sm:$0xff]  ;;  %v95_v15 = vpack.c.bf16 %v87_v13, %v87_v13  ;;  %v1322_v16 = vld [vmem:[#allocation7 + $0x38] sm:$0xff]  }
  0x4b   :  { %1136 = vmatpush3.bf16.msra.mxu1 %v1281_v23  ;;  %1115 = vmatprep.subr.bf16.mxu0 %v1282_v24  ;;  %v1321_v7 = vld [vmem:[#allocation5 + $0x180] sm:$0xff]   ;;  %v94_v10 = vpack.c.bf16 %v86_v8, %v86_v8  ;;  %v1323_v18 = vld [vmem:[#allocation7 + $0x30] sm:$0xff]   ;;  %v1324_v19 = vld [vmem:[#allocation7 + $0x28] sm:$0xff]  }
  0x4c   :  { %1137 = vmatprep.subr.bf16.mxu1 %v1283_v25  ;;  %v85_v12 = vld [vmem:[#allocation2 + $0x20] sm:$0xff]  ;;  %v1326_v21 = vld [vmem:[#allocation7 + $0x18] sm:$0xff]   ;;  %v1327_v22 = vld [vmem:[#allocation7 + $0x10] sm:$0xff]  }
  0x4d   :  { %v93_v14 = vpack.c.bf16 %v85_v12, %v85_v12  ;;  %v1325_v20 = vld [vmem:[#allocation7 + $0x20] sm:$0xff]   ;;  %v1328_v23 = vld [vmem:[#allocation7 + $0x8] sm:$0xff]   ;;  %v1330_v25 = vld [vmem:[#allocation8 + $0x38] sm:$0xff]  }
  0x4e   :  { %1116 = vmatpush3.bf16.msra.mxu0 %v1284_v26  ;;  %v1329_v24 = vld [vmem:[#allocation7] sm:$0xff]   ;;  %v1331_v26 = vld [vmem:[#allocation8 + $0x30] sm:$0xff]  }
  0x4f   :  { %1138 = vmatpush3.bf16.msra.mxu1 %v1285_v27  ;;  %1117 = vmatprep.subr.bf16.mxu0 %v1286_v28  ;;  %v1332_v27 = vld [vmem:[#allocation8 + $0x28] sm:$0xff]   ;;  %v1333_v28 = vld [vmem:[#allocation8 + $0x20] sm:$0xff]  }
  0x50   :  { %1139 = vmatprep.subr.bf16.mxu1 %v1287_v29  ;;  %v1334_v29 = vld [vmem:[#allocation8 + $0x18] sm:$0xff]  }
  0x52   :  { %1118 = vmatpush3.bf16.msra.mxu0 %v1288_v30  ;;  %v1335_v30 = vld [vmem:[#allocation8 + $0x10] sm:$0xff]  }
  0x53   :  { %1140 = vmatpush3.bf16.msra.mxu1 %v1289_v31  ;;  %1147 = vmatprep.subr.bf16.mxu0 %v1290_v40  ;;  %v1020_v40 = vld [vmem:[%s1548_s2] ss:$0 sm:$0xff] }
  0x54   :  { %1169 = vmatprep.subr.bf16.mxu1 %v1291_v41 }
  0x55   :  { %649 = vmatmul.mubr.bf16.vlgmr.msra.gmra.mxu0 %v89_v37 }
  0x56   :  { %689 = vmatmul.mubr.bf16.vlgmr.msra.gmra.mxu1 %v91_v39  ;;  %1148 = vmatpush3.bf16.msra.mxu0 %v1292_v42 }
  0x57   :  { %1170 = vmatpush3.bf16.msra.mxu1 %v1293_v43  ;;  %1149 = vmatprep.subr.bf16.mxu0 %v1294_v44 }
  0x58   :  { %1171 = vmatprep.subr.bf16.mxu1 %v1295_v45  ;;  %728 = vmatprep.mubr.bf16.mxu0 %v94_v10 }
  0x59   :  { %768 = vmatprep.mubr.bf16.mxu1 %v96_v11 }
  0x5a   :  { %1150 = vmatpush3.bf16.msra.mxu0 %v1296_v46 }
  0x5b   :  { %1172 = vmatpush3.bf16.msra.mxu1 %v1297_v47  ;;  %1151 = vmatprep.subr.bf16.mxu0 %v1298_v48 }
  0x5c   :  { %1173 = vmatprep.subr.bf16.mxu1 %v1299_v49 }
  0x5e   :  { %1152 = vmatpush3.bf16.msra.mxu0 %v1300_v50 }
  0x5f   :  { %1174 = vmatpush3.bf16.msra.mxu1 %v1301_v51  ;;  %1153 = vmatprep.subr.bf16.mxu0 %v1302_v52 }
  0x60   :  { %1175 = vmatprep.subr.bf16.mxu1 %v1303_v53 }
  0x62   :  { %1154 = vmatpush3.bf16.msra.mxu0 %v1304_v54 }
  0x63   :  { %1176 = vmatpush3.bf16.msra.mxu1 %v1305_v55  ;;  %1155 = vmatprep.subr.bf16.mxu0 %v1306_v56 }
  0x64   :  { %1177 = vmatprep.subr.bf16.mxu1 %v1307_v57 }
  0x66   :  { %1156 = vmatpush3.bf16.msra.mxu0 %v1308_v58  ;;  %v1336_v58 = vld [vmem:[#allocation8 + $0x8] sm:$0xff]  }
  0x67   :  { %1178 = vmatpush3.bf16.msra.mxu1 %v1309_v59  ;;  %1157 = vmatprep.subr.bf16.mxu0 %v1310_v60  ;;  %v1337_v59 = vld [vmem:[#allocation8] sm:$0xff]  }
  0x68   :  { %1179 = vmatprep.subr.bf16.mxu1 %v1311_v61  ;;  %v1085_v60 = vld [vmem:[%s1550_s4] ss:$0 sm:$0xff]  ;;  %s1418_s4 = scalar_lea.vmem %s1010_s25, 128 }
  0x69   :  { %p1419_p6 = scmp.ne.s32.totalorder %s1010_s25, %s1418_s4  ;;  %p1424_p8 = scmp.lt.s32.totalorder %s1418_s4, %s1418_s4 }
  0x6a   :  { %1158 = vmatpush3.bf16.msra.mxu0 %v1312_v62 }
  0x6b   :  { %1180 = vmatpush3.bf16.msra.mxu1 %v1313_v63  ;;  %1159 = vmatprep.subr.bf16.mxu0 %v1314_v0  ;;  %p1425_p9 = por %p1424_p8, %p1423_p7 }
  0x6c   :  { %1181 = vmatprep.subr.bf16.mxu1 %v1315_v1 }
  0x6d   :  { %p1426_p10 = pnand %p1425_p9, %p1419_p6 }
  0x6e   :  { %1160 = vmatpush3.bf16.msra.mxu0 %v1316_v2 }
  0x6f   :  { %1182 = vmatpush3.bf16.msra.mxu1 %v1317_v3  ;;  %1161 = vmatprep.subr.bf16.mxu0 %v1318_v4  ;;  %v1094_v4 = vld [vmem:[%s1552_s6] ss:$0 sm:$0xff] }
  0x70   :  { %1183 = vmatprep.subr.bf16.mxu1 %v1319_v5 }
  0x72   :  { %1162 = vmatpush3.bf16.msra.mxu0 %v1320_v6 }
  0x73   :  { %1184 = vmatpush3.bf16.msra.mxu1 %v1321_v7  ;;  %1209 = vmatprep.subr.bf16.mxu0 %v1452_v17 }
  0x74   :  { %1229 = vmatprep.subr.bf16.mxu1 %v1452_v17 }
  0x75   :  { %729 = vmatmul.mubr.bf16.vlgmr.msra.gmra.mxu0 %v93_v14 }
  0x76   :  { %769 = vmatmul.mubr.bf16.vlgmr.msra.gmra.mxu1 %v95_v15  ;;  %1210 = vmatpush3.bf16.msra.mxu0 %v1322_v16 }
  0x77   :  { %1211 = vmatprep.subr.bf16.mxu0 %v1452_v17  ;;  %1225 = vmatprep.mubr.msk.bf16.mxu0 %vm1453_vm0, %v1452_v17 }
  0x78   :  { %1245 = vmatprep.mubr.msk.bf16.mxu1 %vm1453_vm0, %v1452_v17  ;;  %1230 = vmatpush3.bf16.msra.mxu1 %v1330_v25 }
  0x79   :  { %1231 = vmatprep.subr.bf16.mxu1 %v1452_v17 }
  0x7a   :  { %1212 = vmatpush3.bf16.msra.mxu0 %v1323_v18 }
  0x7b   :  { %1213 = vmatprep.subr.bf16.mxu0 %v1452_v17 }
  0x7c   :  { %1232 = vmatpush3.bf16.msra.mxu1 %v1331_v26 }
  0x7d   :  { %1233 = vmatprep.subr.bf16.mxu1 %v1452_v17 }
  0x7e   :  { %1214 = vmatpush3.bf16.msra.mxu0 %v1324_v19 }
  0x7f   :  { %1215 = vmatprep.subr.bf16.mxu0 %v1452_v17 }
  0x80   :  { %1234 = vmatpush3.bf16.msra.mxu1 %v1332_v27 }
  0x81   :  { %1235 = vmatprep.subr.bf16.mxu1 %v1452_v17 }
  0x82   :  { %1216 = vmatpush3.bf16.msra.mxu0 %v1325_v20 }
  0x83   :  { %1217 = vmatprep.subr.bf16.mxu0 %v1452_v17 }
  0x84   :  { %1236 = vmatpush3.bf16.msra.mxu1 %v1333_v28 }
  0x85   :  { %1237 = vmatprep.subr.bf16.mxu1 %v1452_v17 }
  0x86   :  { %1218 = vmatpush3.bf16.msra.mxu0 %v1326_v21 }
  0x87   :  { %1219 = vmatprep.subr.bf16.mxu0 %v1452_v17 }
  0x88   :  { %1238 = vmatpush3.bf16.msra.mxu1 %v1334_v29 }
  0x89   :  { %1239 = vmatprep.subr.bf16.mxu1 %v1452_v17 }
  0x8a   :  { %1220 = vmatpush3.bf16.msra.mxu0 %v1327_v22 }
  0x8b   :  { %1221 = vmatprep.subr.bf16.mxu0 %v1452_v17 }
  0x8c   :  { %1240 = vmatpush3.bf16.msra.mxu1 %v1335_v30 }
  0x8d   :  { %1241 = vmatprep.subr.bf16.mxu1 %v1452_v17 }
  0x8e   :  { %1222 = vmatpush3.bf16.msra.mxu0 %v1328_v23 }
  0x8f   :  { %1223 = vmatprep.subr.bf16.mxu0 %v1452_v17 }
  0x90   :  { %1242 = vmatpush3.bf16.msra.mxu1 %v1336_v58 }
  0x91   :  { %1243 = vmatprep.subr.bf16.mxu1 %v1452_v17 }
  0x92   :  { %1224 = vmatpush3.bf16.msra.mxu0 %v1329_v24 }
  0x94   :  { %1244 = vmatpush3.bf16.msra.mxu1 %v1337_v59 }
 0x115   :  { %v1119_v31 = vpop.f32.mrf.mxu0 }
 0x116   :  { %v1141_v32 = vpop.f32.mrf.mxu1 }
 0x117   :  { %v1120_v33 = vpop.f32.mrf.mxu0 }
 0x118   :  { %v1142_v34 = vpop.f32.mrf.mxu1  ;;  %v1121_v39 = vadd.f32 %v1120_v33, %v1119_v31 }
 0x119   :  { %v1122_v35 = vpop.f32.mrf.mxu0  ;;  %v1143_v42 = vadd.f32 %v1142_v34, %v1141_v32 }
 0x11a   :  { %v1144_v36 = vpop.f32.mrf.mxu1  ;;  %v651_v41 = vadd.f32 %v1121_v39, %v1020_v40 }
 0x11b   :  { %v1123_v37 = vpop.f32.mrf.mxu0 }
 0x11c   :  { %v1145_v38 = vpop.f32.mrf.mxu1  ;;  %v691_v46 = vadd.f32 %v1143_v42, %v651_v41 }
 0x135   :  { %v1163_v43 = vpop.f32.mrf.mxu0 }
 0x136   :  { %v1185_v44 = vpop.f32.mrf.mxu1 }
 0x137   :  { %v1164_v45 = vpop.f32.mrf.mxu0 }
 0x138   :  { %v1165_v47 = vadd.f32 %v1164_v45, %v1163_v43  ;;  %v1186_v48 = vpop.f32.mrf.mxu1 }
 0x139   :  { %v1166_v49 = vpop.f32.mrf.mxu0  ;;  %v1187_v51 = vadd.f32 %v1186_v48, %v1185_v44 }
 0x13a   :  { %v731_v50 = vadd.f32 %v1165_v47, %v691_v46  ;;  %v1188_v52 = vpop.f32.mrf.mxu1 }
 0x13b   :  { %v1167_v53 = vpop.f32.mrf.mxu0 }
 0x13c   :  { %v771_v54 = vadd.f32 %v1187_v51, %v731_v50  ;;  %v1189_v55 = vpop.f32.mrf.mxu1 }
 0x13e   :  { %v776_v56 = vmax.f32 %v771_v54, 0.0 }
 0x140   :  { %v777_v57 = vpack.c.bf16 %v776_v56, %v776_v56 }
 0x142   :  { %1226 = vmatmul.mubr.bf16.vlgmr.msra.gmra.mxu0 %v777_v57 }
 0x202   :  { %v883_v61 = vpop.f32.mrf.mxu0 }
 0x203   :  { %v884_v62 = vadd.f32 %v1085_v60, %v883_v61 }
 0x204   :  { %v1227_v63 = vpop.f32.mrf.mxu0 }
 0x205   :  { %v889_v0 = vmax.f32 %v884_v62, 0.0 }
 0x206   :  { %v886_v1 = vpop.f32.mrf.mxu0 }
 0x207   :  { %v890_v2 = vpack.c.bf16 %v889_v0, %v889_v0 }
 0x208   :  { %v1228_v3 = vpop.f32.mrf.mxu0 }
 0x209   :  { %1246 = vmatmul.mubr.bf16.vlgmr.msra.gmra.mxu1 %v890_v2 }
 0x2c9   :  { %v996_v5 = vpop.f32.mrf.mxu1 }
 0x2ca   :  { %v997_v6 = vadd.f32 %v1094_v4, %v996_v5 }
 0x2cb   :  { %v1247_v7 = vpop.f32.mrf.mxu1 }
 0x2cc   :  { %1002 = vst [vmem:[#allocation10] sm:$0xff] %v997_v6 }
 0x2cd   :  { %v999_v8 = vpop.f32.mrf.mxu1 }
 0x2ce   :  { %1429 = shalt.err (!%p1426_p10)
}
 0x2cf   :  { %1012 = dma.vmem_to_hbm [thread:$0]  %s1010_s25, 128, %s1553_s7, [#allocation4]   ;;  %v1248_v9 = vpop.f32.mrf.mxu1 }
 0x2d0   :  { %1444 = dma.done.wait [#allocation4], 128  }
 0x2d1   :  { %1445 = vsyncadd [#allocation4], 4294967168 }
 0x2d2   :  { %1016 = vsyncpa [#allocation3], 1 }
 0x2d3   :  { %1017 = vsyncpa [#allocation6], 1 }
 0x2d4   :  { %1018 = vsyncpa [#allocation9], 1 }
 0x2d5   :  { %1019 = vsyncpa [#allocation4], 1 }

</bundles_post_ra>
